<compile_context>
chip_gen: v7x
topology: tpu7x:2x2x1
jax: 0.10.0
libtpu: 0.0.40
codegen_flags: <defaults>
</compile_context>

<pallas_src>
import jax
import jax.numpy as jnp
from jax.experimental import pallas as pl
from jax.experimental.pallas import tpu as pltpu

EPS = 1e-10  # standard NALU epsilon


def _make_nalu_lm_kernel(seq: int, emb_dim: int):
    D = emb_dim

    def kernel(ids_ref,      # (seq,)        int32 SMEM (scalar prefetch)
               emb_ref,      # (vocab, 1, D) f32   full embedding table, resident in VMEM
               params_ref,   # (3, 2D)       f32   stacked [W_hat; M_hat; G_hat]
               out_ref):     # (1, 128)      f32   lane-padded scalar output
        # ---- gather all seq token embeddings from the VMEM-resident table ----
        rows = [emb_ref[ids_ref[i]] for i in range(seq)]       # each (1, D)
        y = jnp.concatenate(rows, axis=0)                      # (seq, D)
        ly = jnp.log(jnp.abs(y) + EPS)                         # (seq, D), once per token

        # ---- NALU parameters (computed once) ----
        p = params_ref[...]                                    # (3, 2D)
        w = jnp.tanh(p[0:1, :]) * jax.nn.sigmoid(p[1:2, :])    # (1, 2D)
        gh = p[2:3, :]                                         # (1, 2D)
        w_l, w_r = w[:, :D], w[:, D:]
        g_l, g_r = gh[:, :D], gh[:, D:]

        # ---- per-token partial projections, vectorized across tokens ----
        aL = jnp.sum(y * w_l, axis=1, keepdims=True)           # (seq, 1)
        aR = jnp.sum(y * w_r, axis=1, keepdims=True)
        gL = jnp.sum(y * g_l, axis=1, keepdims=True)
        gR = jnp.sum(y * g_r, axis=1, keepdims=True)
        lL = jnp.sum(ly * w_l, axis=1, keepdims=True)
        lR = jnp.sum(ly * w_r, axis=1, keepdims=True)

        # ---- pair (i, i+1): left partial of token i + right partial of token i+1 ----
        a = aL[: seq - 1] + aR[1:]                             # (seq-1, 1)
        g = jax.nn.sigmoid(gL[: seq - 1] + gR[1:])
        m = jnp.exp(lL[: seq - 1] + lR[1:])
        contrib = g * a + (1.0 - g) * m                        # matches torch expression
        t = jnp.sum(contrib)

        out_ref[...] = jnp.broadcast_to(jnp.reshape(t, (1, 1)), out_ref.shape)

    return kernel


def nalu_language_model_forward(token_ids, emb_table, w_hat, m_hat, g_hat):
    """token_ids: (seq, batch) int; returns (1,) float32 — same as the torch module."""
    seq = int(token_ids.shape[0])
    vocab, D = emb_table.shape
    ids = token_ids[:, 0].astype(jnp.int32)           # only batch column 0 is used

    # Table reshaped so the gather index is on a leading (non-tiled) dim.
    emb3 = emb_table.astype(jnp.float32).reshape(vocab, 1, D)
    # One stacked parameter slab: one DMA stream instead of three.
    params = jnp.concatenate([w_hat, m_hat, g_hat], axis=0).astype(jnp.float32)  # (3, 2D)

    grid_spec = pltpu.PrefetchScalarGridSpec(
        num_scalar_prefetch=1,
        grid=(1,),
        in_specs=[
            pl.BlockSpec((vocab, 1, D), lambda i, ids: (0, 0, 0)),   # full table, one DMA
            pl.BlockSpec((3, 2 * D), lambda i, ids: (0, 0)),         # stacked params
        ],
        out_specs=pl.BlockSpec((1, 128), lambda i, ids: (0, 0)),     # lane-dense output
    )

    out = pl.pallas_call(
        _make_nalu_lm_kernel(seq, D),
        grid_spec=grid_spec,
        out_shape=jax.ShapeDtypeStruct((1, 128), jnp.float32),
        compiler_params=pltpu.CompilerParams(dimension_semantics=("arbitrary",)),
    )(ids, emb3, params)

    return out[0, :1]


def _reference_forward(token_ids, emb_table, w_hat, m_hat, g_hat):
    """Pure-JAX reference mirroring the torch loop exactly."""
    y = jnp.take(emb_table, token_ids, axis=0)                   # (seq, batch, D)
    w = jnp.tanh(w_hat) * jax.nn.sigmoid(m_hat)                  # (1, 2D)
    t = jnp.zeros((1,), jnp.float32)
    for i in range(token_ids.shape[0] - 1):
        xi = y[i:i + 2, 0].reshape(1, -1)                        # (1, 2D)
        a = xi @ w.T
        g = jax.nn.sigmoid(xi @ g_hat.T)
        m = jnp.exp(jnp.log(jnp.abs(xi) + EPS) @ w.T)
        t = t + (g * a + (1.0 - g) * m)[:, 0]
    return t


if __name__ == "__main__":
    # module hyper-params (small, consistent with __init__ defaults)
    num_embeddings = 50
    embedding_dim = 32
    seq_len, batch = 8, 2

    key = jax.random.PRNGKey(0)
    k_emb, k_w, k_m, k_g, k_x = jax.random.split(key, 5)

    # deterministic parameter init (synthetic, xavier-ish scale)
    in_dim = 2 * embedding_dim
    limit = (6.0 / (in_dim + 1)) ** 0.5
    emb_table = jax.random.normal(k_emb, (num_embeddings, embedding_dim), jnp.float32)
    w_hat = jax.random.uniform(k_w, (1, in_dim), jnp.float32, -limit, limit)
    m_hat = jax.random.uniform(k_m, (1, in_dim), jnp.float32, -limit, limit)
    g_hat = jax.random.uniform(k_g, (1, in_dim), jnp.float32, -limit, limit)

    # input token ids, shape (seq, batch) like the torch LM convention
    token_ids = jax.random.randint(k_x, (seq_len, batch), 0, num_embeddings, jnp.int32)

    out = nalu_language_model_forward(token_ids, emb_table, w_hat, m_hat, g_hat)
    out = jax.block_until_ready(out)

    ref = _reference_forward(token_ids, emb_table, w_hat, m_hat, g_hat)
    assert out.shape == (1,), out.shape
    assert jnp.allclose(out, ref, rtol=1e-5, atol=1e-5), (out, ref)

    print("KERNEL_OK")
</pallas_src>

<mosaic_0001>
module attributes {stable_mosaic.version = 11 : i64} {
  func.func @kernel(%arg0: i32, %arg1: memref<8xi32, #tpu.memory_space<smem>>, %arg2: memref<50x1x32xf32, #tpu.memory_space<vmem>>, %arg3: memref<3x64xf32, #tpu.memory_space<vmem>>, %arg4: memref<1x128xf32, #tpu.memory_space<vmem>>) attributes {dimension_semantics = [#tpu.dimension_semantics<arbitrary>], iteration_bounds = array<i64: 1>, scalar_prefetch = 1 : i64, scratch_operands = 0 : i64, tpu.core_type = #tpu.core_type<tc>, window_params = [{pipeline_mode = #tpu.pipeline_mode<synchronous>, transform_indices = @transform_0, window_bounds = array<i64: 50, 1, 32>}, {pipeline_mode = #tpu.pipeline_mode<synchronous>, transform_indices = @transform_1, window_bounds = array<i64: 3, 64>}, {pipeline_mode = #tpu.pipeline_mode<synchronous>, transform_indices = @transform_2, window_bounds = array<i64: 1, 128>}]} {
    %c0 = arith.constant 0 : index
    %0 = memref.load %arg1[%c0] : memref<8xi32, #tpu.memory_space<smem>>
    %1 = arith.index_cast %0 : i32 to index
    %c0_0 = arith.constant 0 : index
    %c0_1 = arith.constant 0 : index
    %2 = vector.load %arg2[%1, %c0_0, %c0_1] : memref<50x1x32xf32, #tpu.memory_space<vmem>>, vector<1x1x32xf32>
    %3 = vector.shape_cast %2 : vector<1x1x32xf32> to vector<1x32xf32>
    %c1 = arith.constant 1 : index
    %4 = memref.load %arg1[%c1] : memref<8xi32, #tpu.memory_space<smem>>
    %5 = arith.index_cast %4 : i32 to index
    %c0_2 = arith.constant 0 : index
    %c0_3 = arith.constant 0 : index
    %6 = vector.load %arg2[%5, %c0_2, %c0_3] : memref<50x1x32xf32, #tpu.memory_space<vmem>>, vector<1x1x32xf32>
    %7 = vector.shape_cast %6 : vector<1x1x32xf32> to vector<1x32xf32>
    %c2 = arith.constant 2 : index
    %8 = memref.load %arg1[%c2] : memref<8xi32, #tpu.memory_space<smem>>
    %9 = arith.index_cast %8 : i32 to index
    %c0_4 = arith.constant 0 : index
    %c0_5 = arith.constant 0 : index
    %10 = vector.load %arg2[%9, %c0_4, %c0_5] : memref<50x1x32xf32, #tpu.memory_space<vmem>>, vector<1x1x32xf32>
    %11 = vector.shape_cast %10 : vector<1x1x32xf32> to vector<1x32xf32>
    %c3 = arith.constant 3 : index
    %12 = memref.load %arg1[%c3] : memref<8xi32, #tpu.memory_space<smem>>
    %13 = arith.index_cast %12 : i32 to index
    %c0_6 = arith.constant 0 : index
    %c0_7 = arith.constant 0 : index
    %14 = vector.load %arg2[%13, %c0_6, %c0_7] : memref<50x1x32xf32, #tpu.memory_space<vmem>>, vector<1x1x32xf32>
    %15 = vector.shape_cast %14 : vector<1x1x32xf32> to vector<1x32xf32>
    %c4 = arith.constant 4 : index
    %16 = memref.load %arg1[%c4] : memref<8xi32, #tpu.memory_space<smem>>
    %17 = arith.index_cast %16 : i32 to index
    %c0_8 = arith.constant 0 : index
    %c0_9 = arith.constant 0 : index
    %18 = vector.load %arg2[%17, %c0_8, %c0_9] : memref<50x1x32xf32, #tpu.memory_space<vmem>>, vector<1x1x32xf32>
    %19 = vector.shape_cast %18 : vector<1x1x32xf32> to vector<1x32xf32>
    %c5 = arith.constant 5 : index
    %20 = memref.load %arg1[%c5] : memref<8xi32, #tpu.memory_space<smem>>
    %21 = arith.index_cast %20 : i32 to index
    %c0_10 = arith.constant 0 : index
    %c0_11 = arith.constant 0 : index
    %22 = vector.load %arg2[%21, %c0_10, %c0_11] : memref<50x1x32xf32, #tpu.memory_space<vmem>>, vector<1x1x32xf32>
    %23 = vector.shape_cast %22 : vector<1x1x32xf32> to vector<1x32xf32>
    %c6 = arith.constant 6 : index
    %24 = memref.load %arg1[%c6] : memref<8xi32, #tpu.memory_space<smem>>
    %25 = arith.index_cast %24 : i32 to index
    %c0_12 = arith.constant 0 : index
    %c0_13 = arith.constant 0 : index
    %26 = vector.load %arg2[%25, %c0_12, %c0_13] : memref<50x1x32xf32, #tpu.memory_space<vmem>>, vector<1x1x32xf32>
    %27 = vector.shape_cast %26 : vector<1x1x32xf32> to vector<1x32xf32>
    %c7 = arith.constant 7 : index
    %28 = memref.load %arg1[%c7] : memref<8xi32, #tpu.memory_space<smem>>
    %29 = arith.index_cast %28 : i32 to index
    %c0_14 = arith.constant 0 : index
    %c0_15 = arith.constant 0 : index
    %30 = vector.load %arg2[%29, %c0_14, %c0_15] : memref<50x1x32xf32, #tpu.memory_space<vmem>>, vector<1x1x32xf32>
    %31 = vector.shape_cast %30 : vector<1x1x32xf32> to vector<1x32xf32>
    %32 = tpu.concatenate %3, %7, %11, %15, %19, %23, %27, %31 in 0 : vector<1x32xf32>, vector<1x32xf32>, vector<1x32xf32>, vector<1x32xf32>, vector<1x32xf32>, vector<1x32xf32>, vector<1x32xf32>, vector<1x32xf32> -> vector<8x32xf32>
    %33 = math.absf %32 : vector<8x32xf32>
    %cst = arith.constant 1.000000e-10 : f32
    %34 = vector.broadcast %cst : f32 to vector<8x32xf32>
    %35 = arith.addf %33, %34 : vector<8x32xf32>
    %36 = math.log %35 : vector<8x32xf32>
    %c0_16 = arith.constant 0 : index
    %c0_17 = arith.constant 0 : index
    %37 = vector.load %arg3[%c0_16, %c0_17] : memref<3x64xf32, #tpu.memory_space<vmem>>, vector<3x64xf32>
    %38 = vector.extract_strided_slice %37 {offsets = [0, 0], sizes = [1, 64], strides = [1, 1]} : vector<3x64xf32> to vector<1x64xf32>
    %39 = math.tanh %38 : vector<1x64xf32>
    %40 = vector.extract_strided_slice %37 {offsets = [1, 0], sizes = [1, 64], strides = [1, 1]} : vector<3x64xf32> to vector<1x64xf32>
    %41 = arith.negf %40 : vector<1x64xf32>
    %42 = math.exp %41 : vector<1x64xf32>
    %cst_18 = arith.constant 1.000000e+00 : f32
    %43 = vector.broadcast %cst_18 : f32 to vector<1x64xf32>
    %44 = arith.addf %43, %42 : vector<1x64xf32>
    %45 = arith.divf %43, %44 : vector<1x64xf32>
    %46 = arith.mulf %39, %45 : vector<1x64xf32>
    %47 = vector.extract_strided_slice %37 {offsets = [2, 0], sizes = [1, 64], strides = [1, 1]} : vector<3x64xf32> to vector<1x64xf32>
    %48 = vector.extract_strided_slice %46 {offsets = [0, 0], sizes = [1, 32], strides = [1, 1]} : vector<1x64xf32> to vector<1x32xf32>
    %49 = vector.extract_strided_slice %46 {offsets = [0, 32], sizes = [1, 32], strides = [1, 1]} : vector<1x64xf32> to vector<1x32xf32>
    %50 = vector.extract_strided_slice %47 {offsets = [0, 0], sizes = [1, 32], strides = [1, 1]} : vector<1x64xf32> to vector<1x32xf32>
    %51 = vector.extract_strided_slice %47 {offsets = [0, 32], sizes = [1, 32], strides = [1, 1]} : vector<1x64xf32> to vector<1x32xf32>
    %52 = vector.broadcast %48 : vector<1x32xf32> to vector<8x32xf32>
    %53 = arith.mulf %32, %52 : vector<8x32xf32>
    %cst_19 = arith.constant dense<0.000000e+00> : vector<8xf32>
    %54 = vector.multi_reduction <add>, %53, %cst_19 [1] : vector<8x32xf32> to vector<8xf32>
    %55 = vector.shape_cast %54 : vector<8xf32> to vector<8x1xf32>
    %56 = vector.broadcast %49 : vector<1x32xf32> to vector<8x32xf32>
    %57 = arith.mulf %32, %56 : vector<8x32xf32>
    %cst_20 = arith.constant dense<0.000000e+00> : vector<8xf32>
    %58 = vector.multi_reduction <add>, %57, %cst_20 [1] : vector<8x32xf32> to vector<8xf32>
    %59 = vector.shape_cast %58 : vector<8xf32> to vector<8x1xf32>
    %60 = vector.broadcast %50 : vector<1x32xf32> to vector<8x32xf32>
    %61 = arith.mulf %32, %60 : vector<8x32xf32>
    %cst_21 = arith.constant dense<0.000000e+00> : vector<8xf32>
    %62 = vector.multi_reduction <add>, %61, %cst_21 [1] : vector<8x32xf32> to vector<8xf32>
    %63 = vector.shape_cast %62 : vector<8xf32> to vector<8x1xf32>
    %64 = vector.broadcast %51 : vector<1x32xf32> to vector<8x32xf32>
    %65 = arith.mulf %32, %64 : vector<8x32xf32>
    %cst_22 = arith.constant dense<0.000000e+00> : vector<8xf32>
    %66 = vector.multi_reduction <add>, %65, %cst_22 [1] : vector<8x32xf32> to vector<8xf32>
    %67 = vector.shape_cast %66 : vector<8xf32> to vector<8x1xf32>
    %68 = vector.broadcast %48 : vector<1x32xf32> to vector<8x32xf32>
    %69 = arith.mulf %36, %68 : vector<8x32xf32>
    %cst_23 = arith.constant dense<0.000000e+00> : vector<8xf32>
    %70 = vector.multi_reduction <add>, %69, %cst_23 [1] : vector<8x32xf32> to vector<8xf32>
    %71 = vector.shape_cast %70 : vector<8xf32> to vector<8x1xf32>
    %72 = vector.broadcast %49 : vector<1x32xf32> to vector<8x32xf32>
    %73 = arith.mulf %36, %72 : vector<8x32xf32>
    %cst_24 = arith.constant dense<0.000000e+00> : vector<8xf32>
    %74 = vector.multi_reduction <add>, %73, %cst_24 [1] : vector<8x32xf32> to vector<8xf32>
    %75 = vector.shape_cast %74 : vector<8xf32> to vector<8x1xf32>
    %76 = vector.extract_strided_slice %55 {offsets = [0, 0], sizes = [7, 1], strides = [1, 1]} : vector<8x1xf32> to vector<7x1xf32>
    %77 = vector.extract_strided_slice %59 {offsets = [1, 0], sizes = [7, 1], strides = [1, 1]} : vector<8x1xf32> to vector<7x1xf32>
    %78 = arith.addf %76, %77 : vector<7x1xf32>
    %79 = vector.extract_strided_slice %63 {offsets = [0, 0], sizes = [7, 1], strides = [1, 1]} : vector<8x1xf32> to vector<7x1xf32>
    %80 = vector.extract_strided_slice %67 {offsets = [1, 0], sizes = [7, 1], strides = [1, 1]} : vector<8x1xf32> to vector<7x1xf32>
    %81 = arith.addf %79, %80 : vector<7x1xf32>
    %82 = arith.negf %81 : vector<7x1xf32>
    %83 = math.exp %82 : vector<7x1xf32>
    %cst_25 = arith.constant 1.000000e+00 : f32
    %84 = vector.broadcast %cst_25 : f32 to vector<7x1xf32>
    %85 = arith.addf %84, %83 : vector<7x1xf32>
    %86 = arith.divf %84, %85 : vector<7x1xf32>
    %87 = vector.extract_strided_slice %71 {offsets = [0, 0], sizes = [7, 1], strides = [1, 1]} : vector<8x1xf32> to vector<7x1xf32>
    %88 = vector.extract_strided_slice %75 {offsets = [1, 0], sizes = [7, 1], strides = [1, 1]} : vector<8x1xf32> to vector<7x1xf32>
    %89 = arith.addf %87, %88 : vector<7x1xf32>
    %90 = math.exp %89 : vector<7x1xf32>
    %91 = arith.mulf %86, %78 : vector<7x1xf32>
    %cst_26 = arith.constant 1.000000e+00 : f32
    %92 = vector.broadcast %cst_26 : f32 to vector<7x1xf32>
    %93 = arith.subf %92, %86 : vector<7x1xf32>
    %94 = arith.mulf %93, %90 : vector<7x1xf32>
    %95 = arith.addf %91, %94 : vector<7x1xf32>
    %96 = vector.shape_cast %95 : vector<7x1xf32> to vector<1x7x1xf32>
    %cst_27 = arith.constant dense<0.000000e+00> : vector<1xf32>
    %97 = vector.multi_reduction <add>, %96, %cst_27 [1, 2] : vector<1x7x1xf32> to vector<1xf32>
    %98 = vector.shape_cast %97 : vector<1xf32> to vector<1x1x1xf32>
    %99 = vector.extract %98[0, 0, 0] : f32 from vector<1x1x1xf32>
    %100 = vector.broadcast %99 : f32 to vector<1x1xf32>
    %101 = vector.shape_cast %100 : vector<1x1xf32> to vector<1x1xf32>
    %102 = vector.broadcast %101 : vector<1x1xf32> to vector<1x128xf32>
    %c0_28 = arith.constant 0 : index
    %c0_29 = arith.constant 0 : index
    %103 = vector.load %arg4[%c0_28, %c0_29] : memref<1x128xf32, #tpu.memory_space<vmem>>, vector<1x128xf32>
    tpu.vector_store %arg4[%c0_28, %c0_29], %102 {strides = array<i32>} : memref<1x128xf32, #tpu.memory_space<vmem>>, vector<1x128xf32>,
    return
  }
  func.func @transform_0(%arg0: i32, %arg1: memref<8xi32, #tpu.memory_space<smem>>) -> (i32, i32, i32) {
    %c0_i32 = arith.constant 0 : i32
    %c0_i32_0 = arith.constant 0 : i32
    %c0_i32_1 = arith.constant 0 : i32
    %c0_i32_2 = arith.constant 0 : i32
    return %c0_i32, %c0_i32_0, %c0_i32_1 : i32, i32, i32
  }
  func.func @transform_1(%arg0: i32, %arg1: memref<8xi32, #tpu.memory_space<smem>>) -> (i32, i32) {
    %c0_i32 = arith.constant 0 : i32
    %c0_i32_0 = arith.constant 0 : i32
    %c0_i32_1 = arith.constant 0 : i32
    return %c0_i32, %c0_i32_0 : i32, i32
  }
  func.func @transform_2(%arg0: i32, %arg1: memref<8xi32, #tpu.memory_space<smem>>) -> (i32, i32) {
    %c0_i32 = arith.constant 0 : i32
    %c0_i32_0 = arith.constant 0 : i32
    %c0_i32_1 = arith.constant 0 : i32
    return %c0_i32, %c0_i32_0 : i32, i32
  }
}

</mosaic_0001>

<bundles_post_ra>
// kernel: tpu_custom_call.1
= control target key start
LH: loop header
LB: loop body
LE: loop exit
PB: predicated region body
PF: predicated region fallthrough
CT: control target
= control target key end

     0   :  { %s359_s0 = inlined_call_operand.vmem [shape: s32[8], index: 0, kind: input, shape index: {}]   ;;  %s360_s1 = inlined_call_operand.vmem [shape: f32[50,1,32], index: 1, kind: input, shape index: {}]   ;;  %s361_s2 = inlined_call_operand.vmem [shape: f32[3,64], index: 2, kind: input, shape index: {}]   ;;  %s362_s3 = inlined_call_operand.hbm [shape: f32[1,128], index: 3, kind: output, shape index: {}]  }
   0x1   :  { %s8_s14 = sshll.u32 %s359_s0, 4  ;;  %s9_s14 = int_to_ptr.vmem [resolvable:$true] %s8_s14 }
   0x2   :  { %s250_s15 = scalar_lea.vmem %s9_s14, 16  ;;  %p255_p1 = scmp.lt.s32.totalorder %s9_s14, %s9_s14 }
   0x3   :  { %p251_p0 = scmp.ne.s32.totalorder %s9_s14, %s250_s15  ;;  %p256_p2 = scmp.lt.s32.totalorder %s250_s15, %s250_s15 }
   0x5   :  { %p257_p3 = por %p256_p2, %p255_p1 }
   0x7   :  { %p258_p4 = pnand %p257_p3, %p251_p0 }
   0x9   :  { %261 = shalt.err (!%p258_p4)  }
   0xa   :  { %s288_s16 = smov [#allocation3]  }
   0xb   :  { %11 = dma.vmem_to_smem %s9_s14, 16, %s288_s16, [#allocation2] }
   0xc   :  { %284 = dma.done.wait [#allocation2], 16 }
   0xd   :  { %285 = vsyncadd [#allocation2], 4294967280 }
   0xe   :  { %13 = sfence }
   0xf   :  { %v103_v0 = vld [vmem:[%s361_s2] sm:$0x7]  ;;  %v115_v1 = vlaneseq }
  0x10   :  { %v229_v2 = vmul.f32 -1.442695, %v103_v0 }
  0x11   :  { %v116_v3 = vshrl.u32 %v115_v1, 7 }
  0x12   :  { %236 = vpow2.f32 %v229_v2 }
  0x13   :  { %v134_v4 = vsub.s32 2, %v116_v3 }
  0x14   :  { %14 = vsyncpa [#allocation5], 0  ;;  %s289_s0 = smov 96   ;;  %238 = vtanh.f32 %v103_v0  ;;  %v117_v11 = vsub.s32 0, %v116_v3  ;;  %s19_s2 = sld [smem:[#allocation3]]  ;;  %vm85_vm0 = vcmask 1040384  }
  0x15   :  { %v135_v5 = vrot.slane %v103_v0, %v134_v4  ;;  %s215_s19 = sld [smem:[#allocation3 + $0x1]]  ;;  %s216_s20 = sld [smem:[#allocation3 + $0x2]]  ;;  %vm87_vm1 = vcmask 1041408   ;;  %vm89_vm2 = vcmask 1042432   ;;  %vm91_vm3 = vcmask 1043456  }
  0x16   :  { %s217_s21 = sld [smem:[#allocation3 + $0x3]]  ;;  %s218_s28 = sld [smem:[#allocation3 + $0x4]]  ;;  %vm93_vm4 = vcmask 1044480   ;;  %vm95_vm5 = vcmask 1045504   ;;  %vm97_vm6 = vcmask 1046528   ;;  %vm120_vm7 = vcmask 261120  }
  0x17   :  { %141 = vrot.lane.b32.xlu0 %v135_v5, %s289_s0  ;;  %s219_s5 = sld [smem:[#allocation3 + $0x5]]  ;;  %s220_s9 = sld [smem:[#allocation3 + $0x6]]  ;;  %vm180_vm8 = vcmask 6144  }
  0x18   :  { %s221_s13 = sld [smem:[#allocation3 + $0x7]] }
  0x1a   :  { %s20_s24 = scalar_lea.vmem %s360_s1, %s19_s2 }
  0x1b   :  { %s23_s27 = scalar_lea.vmem %s360_s1, %s215_s19  ;;  %v21_v14 = vld [vmem:[%s20_s24] sm:$0x1]  ;;  %s26_s4 = scalar_lea.vmem %s360_s1, %s216_s20 }
  0x1c   :  { %v237_v6 = vpop.eup %236  ;;  %v222_v15 = vld [vmem:[%s23_s27] ss:$0 sm:$0xff]  ;;  %s29_s8 = scalar_lea.vmem %s360_s1, %s217_s21  ;;  %s32_s12 = scalar_lea.vmem %s360_s1, %s218_s28 }
  0x1d   :  { %v108_v7 = vadd.f32 1.0, %v237_v6  ;;  %v223_v16 = vld [vmem:[%s26_s4] ss:$0 sm:$0xff]  ;;  %v86_v17 = vsel %vm85_vm0, %v21_v14, %v222_v15  ;;  %s35_s16 = scalar_lea.vmem %s360_s1, %s219_s5 }
  0x1e   :  { %v239_v8 = vpop.eup %238  ;;  %v224_v18 = vld [vmem:[%s29_s8] ss:$0 sm:$0xff]  ;;  %v88_v19 = vsel %vm87_vm1, %v86_v17, %v223_v16  ;;  %s41_s20 = scalar_lea.vmem %s360_s1, %s221_s13 }
  0x1f   :  { %240 = vrcp.f32 %v108_v7  ;;  %v225_v20 = vld [vmem:[%s32_s12] ss:$0 sm:$0xff]  ;;  %v90_v21 = vsel %vm89_vm2, %v88_v19, %v224_v18 }
  0x20   :  { %v226_v22 = vld [vmem:[%s35_s16] ss:$0 sm:$0xff]  ;;  %v92_v23 = vsel %vm91_vm3, %v90_v21, %v225_v20 }
  0x21   :  { %v94_v25 = vsel %vm93_vm4, %v92_v23, %v226_v22  ;;  %v228_v26 = vld [vmem:[%s41_s20] ss:$0 sm:$0xff] }
  0x29   :  { %v241_v9 = vpop.eup %240 }
  0x2a   :  { %v112_v10 = vrot.slane %v241_v9, 1 }
  0x2c   :  { %v114_v12 = vmul.f32 %v239_v8, %v112_v10 }
  0x2e   :  { %v118_v13 = vrot.slane %v114_v12, %v117_v11 }
  0x30   :  { %125 = vrot.lane.b32.xlu0 %v118_v13, %s289_s0  ;;  %s38_s0 = scalar_lea.vmem %s360_s1, %s220_s9  ;;  %s290_s1 = smov [#allocation4]  }
  0x31   :  { %v227_v24 = vld [vmem:[%s38_s0] ss:$0 sm:$0xff]  ;;  %s199_s21 = sshll.u32 %s290_s1, 4  ;;  %s200_s21 = int_to_ptr.vmem [resolvable:$true] %s199_s21 }
  0x32   :  { %v96_v27 = vsel %vm95_vm5, %v94_v25, %v227_v24  ;;  %s262_s23 = scalar_lea.vmem %s200_s21, 16  ;;  %s266_s24 = scalar_lea.vmem %s200_s21, 32 }
  0x33   :  { %v98_v28 = vsel %vm97_vm6, %v96_v27, %v228_v26  ;;  %p263_p5 = scmp.ne.s32.totalorder %s200_s21, %s262_s23  ;;  %p267_p6 = scmp.lt.s32.totalorder %s200_s21, %s200_s21 }
  0x34   :  { %v99_v29 = vand.u32 2147483647, %v98_v28  ;;  %v136_v34 = vmul.f32 %v135_v5, %v98_v28  ;;  %v119_v43 = vmul.f32 %v118_v13, %v98_v28  ;;  %p268_p7 = scmp.lt.s32.totalorder %s266_s24, %s262_s23 }
  0x36   :  { %v100_v30 = vadd.f32 1e-10, %v99_v29  ;;  %v137_v37 = vsel %vm120_vm7, %v136_v34, 0.0  ;;  %v121_v46 = vsel %vm120_vm7, %v119_v43, 0.0  ;;  %p269_p8 = por %p268_p7, %p267_p6 }
  0x38   :  { %242 = vlog2.f32 %v100_v30  ;;  %p270_p9 = pnand %p269_p8, %p263_p5 }
  0x42   :  { %v243_v31 = vpop.eup %242 }
  0x43   :  { %v102_v35 = vmul.f32 0.6931472, %v243_v31 }
  0x45   :  { %v148_v38 = vmul.f32 %v118_v13, %v102_v35 }
  0x47   :  { %v149_v39 = vsel %vm120_vm7, %v148_v38, 0.0 }
  0x89   :  { %v142_v32 = vpop.permute.xlu0 %141 }
  0x8a   :  { %v144_v33 = vmul.f32 %v142_v32, %v98_v28 }
  0x8c   :  { %v145_v36 = vsel %vm120_vm7, %v144_v33, 0.0 }
  0x8d   :  { %146 = vadd.xlane.f32.xlu1 %v145_v36 }
  0x91   :  { %138 = vadd.xlane.f32.xlu1 %v137_v37 }
  0x95   :  { %150 = vadd.xlane.f32.xlu1 %v149_v39 }
  0xa2   :  { %v126_v40 = vpop.permute.xlu0 %125 }
  0xa3   :  { %v128_v41 = vmul.f32 %v126_v40, %v98_v28  ;;  %v152_v42 = vmul.f32 %v126_v40, %v102_v35 }
  0xa5   :  { %v153_v44 = vsel %vm120_vm7, %v152_v42, 0.0  ;;  %v129_v45 = vsel %vm120_vm7, %v128_v41, 0.0 }
  0xa6   :  { %154 = vadd.xlane.f32.xlu0 %v153_v44  ;;  %130 = vadd.xlane.f32.xlu1 %v129_v45 }
  0xaa   :  { %122 = vadd.xlane.f32.xlu1 %v121_v46 }
 0x11a   :  { %v147_v47 = vpop.xlane.xlu1 %146 }
 0x11b   :  { %v161_v48 = vrot.slane %v147_v47, 1 }
 0x11e   :  { %v139_v49 = vpop.xlane.xlu1 %138 }
 0x11f   :  { %v163_v50 = vadd.f32 %v161_v48, %v139_v49 }
 0x121   :  { %v230_v51 = vmul.f32 -1.442695, %v163_v50 }
 0x122   :  { %v151_v53 = vpop.xlane.xlu1 %150 }
 0x123   :  { %244 = vpow2.f32 %v230_v51 }
 0x12d   :  { %v245_v52 = vpop.eup %244 }
 0x12e   :  { %v167_v55 = vadd.f32 1.0, %v245_v52 }
 0x130   :  { %246 = vrcp.f32 %v167_v55 }
 0x133   :  { %v155_v54 = vpop.xlane.xlu0 %154  ;;  %v131_v59 = vpop.xlane.xlu1 %130 }
 0x134   :  { %v171_v56 = vrot.slane %v155_v54, 1  ;;  %v157_v61 = vrot.slane %v131_v59, 1 }
 0x136   :  { %v173_v57 = vadd.f32 %v171_v56, %v151_v53 }
 0x137   :  { %v123_v60 = vpop.xlane.xlu1 %122 }
 0x138   :  { %v174_v58 = vmul.f32 1.442695, %v173_v57  ;;  %v159_v62 = vadd.f32 %v157_v61, %v123_v60 }
 0x13a   :  { %248 = vpow2.f32 %v174_v58  ;;  %v247_v63 = vpop.eup %246 }
 0x13b   :  { %v177_v0 = vsub.f32 1.0, %v247_v63  ;;  %v176_v2 = vmul.f32 %v247_v63, %v159_v62 }
 0x144   :  { %v249_v1 = vpop.eup %248 }
 0x145   :  { %v178_v3 = vmul.f32 %v249_v1, %v177_v0 }
 0x147   :  { %v179_v4 = vadd.f32 %v178_v3, %v176_v2 }
 0x149   :  { %v181_v5 = vsel %vm180_vm8, %v179_v4, 0.0 }
 0x14a   :  { %182 = vadd.xlane.f32.xlu1 %v181_v5 }
 0x1d7   :  { %v183_v6 = vpop.xlane.xlu1 %182 }
 0x1d8   :  { %v184_v7 = vrot.slane %v183_v6, 4 }
 0x1da   :  { %v185_v8 = vadd.f32 %v184_v7, %v183_v6 }
 0x1dc   :  { %v186_v9 = vrot.slane %v185_v8, 2 }
 0x1de   :  { %v187_v10 = vadd.f32 %v186_v9, %v185_v8 }
 0x1e0   :  { %v188_v11 = vrot.slane %v187_v10, 1 }
 0x1e2   :  { %v189_v12 = vadd.f32 %v188_v11, %v187_v10 }
 0x1e4   :  { %231 = vpush %v189_v12 }
 0x215   :  { %s232_s22 = spop %231 }
 0x216   :  { %v191_v13 = vstv %s232_s22 }
 0x217   :  { %192 = vst [vmem:[#allocation4] sm:$0x1] %v191_v13 }
 0x218   :  { %273 = shalt.err (!%p270_p9)
}
 0x219   :  { %s274_s27 = scalar_lea.hbm %s362_s3, 16 }
 0x21a   :  { %p275_p10 = scmp.ne.s32.totalorder %s362_s3, %s274_s27  ;;  %p278_p11 = scmp.lt.u32.totalorder %s274_s27, %s362_s3 }
 0x21c   :  { %p280_p12 = pnand %p278_p11, %p275_p10 }
 0x21e   :  { %283 = shalt.err (!%p280_p12)
}
 0x21f   :  { %202 = dma.vmem_to_hbm [thread:$0]  %s200_s21, 16, %s362_s3, [#allocation5]  }
 0x220   :  { %286 = dma.done.wait [#allocation5], 16  }
 0x221   :  { %287 = vsyncadd [#allocation5], 4294967280 }
 0x222   :  { %206 = vsyncpa [#allocation5], 1 }

</bundles_post_ra>
